<compile_context>
chip_gen: v5e
topology: v5e:2x2
jax: 0.10.0
libtpu: 0.0.40
codegen_flags: <defaults>
</compile_context>

<pallas_src>
import functools

import jax
import jax.numpy as jnp
from jax.experimental import pallas as pl
from jax.experimental.pallas import tpu as pltpu

_LANE = 128
_SUBLANE = 8
_MAX_BLOCK_D = 4096                      # feature-tile cap (multiple of 128)
_TARGET_BLOCK_ELEMS = 2 * 1024 * 1024    # ~8 MiB per f32 block (VMEM-layout elems)


def _round_up(x, m):
    return ((x + m - 1) // m) * m


def _round_down(x, m):
    return (x // m) * m


@functools.lru_cache(maxsize=1)
def _hw_params():
    """Return (num_tensorcores_to_balance_for, vmem_limit_bytes)."""
    vmem_cap = None
    try:
        vmem_cap = int(pltpu.get_tpu_info().vmem_capacity_bytes)
    except Exception:
        pass
    kind = ""
    try:
        kind = jax.devices()[0].device_kind.lower()
    except Exception:
        pass
    is_v7 = (
        any(tag in kind for tag in ("v7", "7x", "tpu7"))
        or (vmem_cap is not None and vmem_cap <= 64 * 1024 * 1024)
    )
    if is_v7:
        # 2 TensorCores / chip, 64 MiB physical VMEM per TC -> leave headroom.
        return 2, 44 * 1024 * 1024
    # v5e / v6e: single TensorCore, 128 MiB physical VMEM.
    return 1, 64 * 1024 * 1024


# ------------------------------------------------------------- math bodies --

def _direct_body(x):
    """(sigmoid(x), log(sigmoid(x)*(1-sigmoid(x)))) computed stably in f32."""
    x = x.astype(jnp.float32)
    ax = jnp.abs(x)
    e = jnp.exp(-ax)                         # exp(-|x|) in (0, 1]
    s = jnp.where(x >= 0, 1.0, e) / (1.0 + e)
    # log(s*(1-s)) = -(softplus(x) + softplus(-x)) = -(|x| + 2*log1p(exp(-|x|)))
    term = -(ax + 2.0 * jnp.log1p(e))
    return s, term


def _inverse_body(x):
    """(log(x/(1-x)), log(x - x**2)) sharing the two logs (no divide)."""
    x = x.astype(jnp.float32)
    lx = jnp.log(x)
    l1mx = jnp.log1p(-x)
    return lx - l1mx, lx + l1mx


# ------------------------------------------------------------------ kernels --

def _kernel_1d(x_ref, y_ref, ld_ref, *, body, sign):
    """1-D batch grid: the full feature axis lives in one block."""
    y, term = body(x_ref[...])
    y_ref[...] = y.astype(y_ref.dtype)
    ld_ref[...] = sign * jnp.sum(term, axis=-1, keepdims=True)


def _kernel_2d(x_ref, y_ref, ld_ref, *, body, sign, valid_d, block_d):
    """2-D grid (batch, feature); feature axis is the reduction axis (last).
    Log-det is accumulated in the resident (bm, 1) output block."""
    j = pl.program_id(1)

    @pl.when(j == 0)
    def _():
        ld_ref[...] = jnp.zeros_like(ld_ref)

    y, term = body(x_ref[...])
    y_ref[...] = y.astype(y_ref.dtype)

    if valid_d % block_d == 0:
        ld_ref[...] += sign * jnp.sum(term, axis=-1, keepdims=True)
    else:
        last = pl.num_programs(1) - 1

        @pl.when(j < last)
        def _():
            ld_ref[...] += sign * jnp.sum(term, axis=-1, keepdims=True)

        @pl.when(j == last)
        def _():
            # Only the final feature block has out-of-range columns to mask.
            col = j * block_d + jax.lax.broadcasted_iota(jnp.int32, term.shape, 1)
            masked = jnp.where(col < valid_d, term, 0.0)
            ld_ref[...] += sign * jnp.sum(masked, axis=-1, keepdims=True)


# ----------------------------------------------------------------- wrappers --

def _choose_tiles(B, D, block_batch, block_d, num_tc):
    if block_d is None:
        block_d = D if D <= _MAX_BLOCK_D else _MAX_BLOCK_D
    block_d = min(block_d, D)
    if block_d < D and block_d % _LANE != 0:
        raise ValueError("block_d must be a multiple of 128 unless it covers all of D")

    if block_batch is not None:
        block_batch = min(block_batch, B)
        if block_batch < B and block_batch % _SUBLANE != 0:
            raise ValueError(
                "block_batch must be a multiple of 8 unless it covers all of B")
        return block_batch, block_d

    # Rows per block targeting ~_TARGET_BLOCK_ELEMS f32 elements *in VMEM
    # layout* (last dim padded to the 128-lane width).
    padded_d = _round_up(block_d, _LANE)
    target = max(_SUBLANE, _TARGET_BLOCK_ELEMS // padded_d)

    if num_tc <= 1 or B <= _SUBLANE:
        # Single TensorCore (or nothing to split): fewest, largest blocks.
        if B <= target:
            bm = B
        else:
            bm = max(_SUBLANE, _round_down(min(target, B), _SUBLANE))
    else:
        # Megacore (v7x): even number of near-equal batch blocks so neither
        # TensorCore sits idle or carries a longer tail.
        n = pl.cdiv(B, min(target, B))
        n = max(2, 2 * pl.cdiv(n, 2))
        bm = min(B, _round_up(pl.cdiv(B, n), _SUBLANE))
    return bm, block_d


def _run_branch(body, sign, inputs, *, block_batch=None, block_d=None):
    if inputs.ndim != 2:
        # Sum is over the last axis with keepdim; flatten leading dims.
        lead = inputs.shape[:-1]
        y, ld = _run_branch(body, sign, inputs.reshape(-1, inputs.shape[-1]),
                            block_batch=block_batch, block_d=block_d)
        return y.reshape(inputs.shape), ld.reshape(lead + (1,))

    B, D = inputs.shape
    num_tc, vmem_limit = _hw_params()
    bm, bd = _choose_tiles(B, D, block_batch, block_d, num_tc)
    nb, nj = pl.cdiv(B, bm), pl.cdiv(D, bd)

    out_shape = (
        jax.ShapeDtypeStruct((B, D), inputs.dtype),
        jax.ShapeDtypeStruct((B, 1), jnp.float32),   # log-det kept in f32
    )

    if nj == 1:
        kernel = functools.partial(_kernel_1d, body=body, sign=sign)
        grid = (nb,)
        in_specs = [pl.BlockSpec((bm, bd), lambda i: (i, 0))]
        out_specs = (pl.BlockSpec((bm, bd), lambda i: (i, 0)),
                     pl.BlockSpec((bm, 1), lambda i: (i, 0)))
        dims = ("parallel",)
    else:
        kernel = functools.partial(_kernel_2d, body=body, sign=sign,
                                   valid_d=D, block_d=bd)
        grid = (nb, nj)                               # reduction axis last
        in_specs = [pl.BlockSpec((bm, bd), lambda i, j: (i, j))]
        out_specs = (pl.BlockSpec((bm, bd), lambda i, j: (i, j)),
                     pl.BlockSpec((bm, 1), lambda i, j: (i, 0)))  # resident acc
        dims = ("parallel", "arbitrary")

    y, ld = pl.pallas_call(
        kernel,
        out_shape=out_shape,
        grid=grid,
        in_specs=in_specs,
        out_specs=out_specs,
        compiler_params=pltpu.CompilerParams(
            dimension_semantics=dims,
            vmem_limit_bytes=vmem_limit,
        ),
    )(inputs)
    return y, ld


def sigmoid_forward(inputs, cond_inputs=None, mode="direct", *,
                    block_batch=None, block_d=None):
    """Pallas equivalent of Sigmoid.forward (cond_inputs unused, as in PyTorch)."""
    if mode == "direct":
        return _run_branch(_direct_body, 1.0, inputs,
                           block_batch=block_batch, block_d=block_d)
    return _run_branch(_inverse_body, -1.0, inputs,
                       block_batch=block_batch, block_d=block_d)


def logit_forward(inputs, cond_inputs=None, mode="direct", *,
                  block_batch=None, block_d=None):
    """Pallas equivalent of Logit.forward.  Faithful to the original call
    pattern: the string is passed POSITIONALLY into `cond_inputs`, so
    Sigmoid.forward always runs with its default mode='direct'."""
    if mode == "direct":
        return sigmoid_forward(inputs, "inverse",
                               block_batch=block_batch, block_d=block_d)
    return sigmoid_forward(inputs, "direct",
                           block_batch=block_batch, block_d=block_d)


# --------------------------------------------------------------------- main --

if __name__ == "__main__":
    key = jax.random.PRNGKey(0)
    k1, k2, k3, k4 = jax.random.split(key, 4)

    # ---- small flow-style shape (batch, features) --------------------------
    B, D = 16, 128
    x = jax.random.normal(k1, (B, D), dtype=jnp.float32)

    y, logdet = jax.block_until_ready(logit_forward(x, mode="direct"))

    s_ref = jax.nn.sigmoid(x)
    ld_ref = jnp.sum(jnp.log(s_ref * (1.0 - s_ref)), axis=-1, keepdims=True)
    assert y.shape == (B, D) and logdet.shape == (B, 1)
    assert jnp.allclose(y, s_ref, atol=1e-5, rtol=1e-5)
    assert jnp.allclose(logdet, ld_ref, atol=2e-3, rtol=1e-4)

    # Both Logit modes hit the same direct-sigmoid branch (positional string
    # arg quirk of the original code), so results are identical.
    y2, logdet2 = jax.block_until_ready(logit_forward(x, mode="inverse"))
    assert jnp.allclose(y2, s_ref, atol=1e-5, rtol=1e-5)
    assert jnp.allclose(logdet2, ld_ref, atol=2e-3, rtol=1e-4)

    # ---- tiled 2-D path: multi-block batch + feature grid, edge masking ----
    B2, D2 = 200, 320
    x2 = jax.random.normal(k2, (B2, D2), dtype=jnp.float32)
    y3, logdet3 = jax.block_until_ready(
        sigmoid_forward(x2, mode="direct", block_batch=104, block_d=128))
    s3 = jax.nn.sigmoid(x2)
    ld3 = jnp.sum(jnp.log(s3 * (1.0 - s3)), axis=-1, keepdims=True)
    assert y3.shape == (B2, D2) and logdet3.shape == (B2, 1)
    assert jnp.allclose(y3, s3, atol=1e-5, rtol=1e-5)
    assert jnp.allclose(logdet3, ld3, atol=2e-3, rtol=1e-4)

    # ---- inverse branch of the Sigmoid base class (x strictly in (0, 1)) ----
    u = jax.random.uniform(k3, (B, D), dtype=jnp.float32, minval=0.05, maxval=0.95)
    yi, ldi = jax.block_until_ready(sigmoid_forward(u, mode="inverse"))
    yi_ref = jnp.log(u / (1.0 - u))
    ldi_ref = -jnp.sum(jnp.log(u - u * u), axis=-1, keepdims=True)
    assert jnp.allclose(yi, yi_ref, atol=1e-4, rtol=1e-5)
    assert jnp.allclose(ldi, ldi_ref, atol=1e-3, rtol=1e-4)

    # ---- >2-D input (leading dims flattened, keepdim on last axis) ---------
    x4 = jax.random.normal(k4, (2, 4, 32), dtype=jnp.float32)
    y4, ld4 = jax.block_until_ready(logit_forward(x4))
    s4 = jax.nn.sigmoid(x4)
    ld4_ref = jnp.sum(jnp.log(s4 * (1.0 - s4)), axis=-1, keepdims=True)
    assert y4.shape == (2, 4, 32) and ld4.shape == (2, 4, 1)
    assert jnp.allclose(y4, s4, atol=1e-5, rtol=1e-5)
    assert jnp.allclose(ld4, ld4_ref, atol=2e-3, rtol=1e-4)

    print("KERNEL_OK")
</pallas_src>

<mosaic_0001>
module attributes {stable_mosaic.version = 11 : i64} {
  func.func @_kernel_1d(%arg0: i32, %arg1: memref<16x128xf32, #tpu.memory_space<vmem>>, %arg2: memref<16x128xf32, #tpu.memory_space<vmem>>, %arg3: memref<16x1xf32, #tpu.memory_space<vmem>>) attributes {dimension_semantics = [#tpu.dimension_semantics<parallel>], iteration_bounds = array<i64: 1>, scalar_prefetch = 0 : i64, scratch_operands = 0 : i64, tpu.core_type = #tpu.core_type<tc>, window_params = [{transform_indices = @transform_0, window_bounds = array<i64: 16, 128>}, {transform_indices = @transform_1, window_bounds = array<i64: 16, 128>}, {transform_indices = @transform_2, window_bounds = array<i64: 16, 1>}]} {
    %c0 = arith.constant 0 : index
    %c0_0 = arith.constant 0 : index
    %0 = vector.load %arg1[%c0, %c0_0] : memref<16x128xf32, #tpu.memory_space<vmem>>, vector<16x128xf32>
    %1 = math.absf %0 : vector<16x128xf32>
    %cst = arith.constant 0.000000e+00 : f32
    %2 = vector.broadcast %cst : f32 to vector<16x128xf32>
    %3 = arith.subf %2, %1 : vector<16x128xf32>
    %4 = math.exp %3 : vector<16x128xf32>
    %cst_1 = arith.constant 0.000000e+00 : f32
    %5 = vector.broadcast %cst_1 : f32 to vector<16x128xf32>
    %6 = arith.cmpf oge, %0, %5 : vector<16x128xf32>
    %cst_2 = arith.constant 1.000000e+00 : f32
    %7 = vector.broadcast %cst_2 : f32 to vector<16x128xf32>
    %8 = arith.select %6, %7, %4 : vector<16x128xi1>, vector<16x128xf32>
    %cst_3 = arith.constant 1.000000e+00 : f32
    %9 = vector.broadcast %cst_3 : f32 to vector<16x128xf32>
    %10 = arith.addf %9, %4 : vector<16x128xf32>
    %11 = arith.divf %8, %10 : vector<16x128xf32>
    %12 = math.log1p %4 : vector<16x128xf32>
    %cst_4 = arith.constant 2.000000e+00 : f32
    %13 = vector.broadcast %cst_4 : f32 to vector<16x128xf32>
    %14 = arith.mulf %13, %12 : vector<16x128xf32>
    %15 = arith.addf %1, %14 : vector<16x128xf32>
    %cst_5 = arith.constant 0.000000e+00 : f32
    %16 = vector.broadcast %cst_5 : f32 to vector<16x128xf32>
    %17 = arith.subf %16, %15 : vector<16x128xf32>
    %c0_6 = arith.constant 0 : index
    %c0_7 = arith.constant 0 : index
    %18 = vector.load %arg2[%c0_6, %c0_7] : memref<16x128xf32, #tpu.memory_space<vmem>>, vector<16x128xf32>
    tpu.vector_store %arg2[%c0_6, %c0_7], %11 {strides = array<i32>} : memref<16x128xf32, #tpu.memory_space<vmem>>, vector<16x128xf32>,
    %cst_8 = arith.constant dense<0.000000e+00> : vector<16xf32>
    %19 = vector.multi_reduction <add>, %17, %cst_8 [1] : vector<16x128xf32> to vector<16xf32>
    %20 = vector.shape_cast %19 : vector<16xf32> to vector<16x1xf32>
    %cst_9 = arith.constant 1.000000e+00 : f32
    %21 = vector.broadcast %cst_9 : f32 to vector<16x1xf32>
    %22 = arith.mulf %21, %20 : vector<16x1xf32>
    %c0_10 = arith.constant 0 : index
    %c0_11 = arith.constant 0 : index
    %23 = vector.load %arg3[%c0_10, %c0_11] : memref<16x1xf32, #tpu.memory_space<vmem>>, vector<16x1xf32>
    tpu.vector_store %arg3[%c0_10, %c0_11], %22 {strides = array<i32>} : memref<16x1xf32, #tpu.memory_space<vmem>>, vector<16x1xf32>,
    return
  }
  func.func @transform_0(%arg0: i32) -> (i32, i32) {
    %c0_i32 = arith.constant 0 : i32
    %c0_i32_0 = arith.constant 0 : i32
    return %arg0, %c0_i32 : i32, i32
  }
  func.func @transform_1(%arg0: i32) -> (i32, i32) {
    %c0_i32 = arith.constant 0 : i32
    %c0_i32_0 = arith.constant 0 : i32
    return %arg0, %c0_i32 : i32, i32
  }
  func.func @transform_2(%arg0: i32) -> (i32, i32) {
    %c0_i32 = arith.constant 0 : i32
    %c0_i32_0 = arith.constant 0 : i32
    return %arg0, %c0_i32 : i32, i32
  }
}

</mosaic_0001>

<bundles_post_ra>
// kernel: tpu_custom_call.1
= control target key start
LH: loop header
LB: loop body
LE: loop exit
PB: predicated region body
PF: predicated region fallthrough
CT: control target
= control target key end

     0   :  { %8 = vsyncpa [#allocation3], 0  ;;  %s238_s0 = inlined_call_operand.hbm [shape: f32[16,128], index: 0, kind: input, shape index: {}]   ;;  %s239_s1 = inlined_call_operand.hbm [shape: f32[16,128], index: 1, kind: output, shape index: {0}]   ;;  %s240_s2 = inlined_call_operand.vmem [shape: f32[16,1], index: 2, kind: output, shape index: {1}]  }
   0x1   :  { %9 = vsyncpa [#allocation4], 0  ;;  %s14_s11 = sshll.u32 %s238_s0, 4  ;;  %s197_s12 = smov [#allocation2]   ;;  %s15_s11 = int_to_ptr.hbm [resolvable:$true] %s14_s11 }
   0x2   :  { %s16_s13 = sshll.u32 %s197_s12, 4  ;;  %s198_s14 = smov 128   ;;  %s17_s13 = int_to_ptr.vmem [resolvable:$true] %s16_s13 }
   0x3   :  { %s199_s15 = smov 8  }
   0x4   :  { %22 = dma.hbm_to_vmem [thread:$0]  %s15_s11, 256, %s17_s13, [#allocation3], %s198_s14, %s198_s14, %s199_s15  }
   0x5   :  { %193 = dma.done.wait [#allocation3], 256  }
   0x6   :  { %194 = vsyncadd [#allocation3], 4294967040  ;;  %v27_v0 = vld [vmem:[#allocation2] sm:$0xff]  ;;  %v28_v1 = vld [vmem:[#allocation2 + $0x8] sm:$0xff]  ;;  %s200_s0 = smov [#allocation5]   ;;  %s112_s19 = sshll.u32 %s239_s1, 4  ;;  %s113_s19 = int_to_ptr.hbm [resolvable:$true] %s112_s19 }
   0x7   :  { %v29_v2 = vand.u32 2147483647, %v27_v0  ;;  %v30_v3 = vand.u32 2147483647, %v28_v1  ;;  %vm38_vm0 = vcmp.ge.f32.partialorder %v28_v1, 0.0  ;;  %vm37_vm5 = vcmp.ge.f32.partialorder %v27_v0, 0.0 }
   0x8   :  { %s110_s16 = sshll.u32 %s200_s0, 4  ;;  %vm103_vm12 = vcmask 7168   ;;  %s111_s16 = int_to_ptr.vmem [resolvable:$true] %s110_s16 }
   0x9   :  { %v31_v4 = vsub.f32 0.0, %v29_v2  ;;  %v32_v5 = vsub.f32 0.0, %v30_v3 }
   0xb   :  { %v33_v6 = vmul.f32 1.442695, %v31_v4  ;;  %v35_v7 = vmul.f32 1.442695, %v32_v5 }
   0xd   :  { %133 = vpow2.f32 %v33_v6 }
   0xe   :  { %135 = vpow2.f32 %v35_v7 }
  0x13   :  { %v134_v8 = vpop.eup %133 }
  0x14   :  { %v136_v9 = vpop.eup %135  ;;  %v41_v10 = vadd.f32 1.0, %v134_v8  ;;  %v76_v11 = vmul.f32 -0.5, %v134_v8  ;;  %v79_v16 = vand.u32 2147483647, %v134_v8  ;;  %v39_v39 = vsel %vm37_vm5, 1.0, %v134_v8 }
  0x15   :  { %v222_v12 = vsel %vm38_vm0, 1.0, %v136_v9  ;;  %v42_v13 = vadd.f32 1.0, %v136_v9  ;;  %v85_v14 = vmul.f32 -0.5, %v136_v9  ;;  %v88_v19 = vand.u32 2147483647, %v136_v9 }
  0x16   :  { %137 = vlog2.f32 %v41_v10  ;;  %v77_v15 = vadd.f32 1.0, %v76_v11  ;;  %vm80_vm1 = vcmp.lt.f32.partialorder %v79_v16, 0.0004427343  ;;  %vm48_vm2 = vweird.f32 %v41_v10 }
  0x17   :  { %139 = vrcp.f32 %v41_v10  ;;  %v86_v17 = vadd.f32 1.0, %v85_v14  ;;  %v52_v27 = vand.u32 2147483647, %v41_v10  ;;  %v54_v28 = vand.u32 2147483648, %v41_v10 }
  0x18   :  { %141 = vlog2.f32 %v42_v13  ;;  %v78_v18 = vmul.f32 %v134_v8, %v77_v15  ;;  %vm89_vm3 = vcmp.lt.f32.partialorder %v88_v19, 0.0004427343  ;;  %v69_v49 = vand.u32 2147483648, %v42_v13 }
  0x19   :  { %v87_v24 = vmul.f32 %v136_v9, %v86_v17  ;;  %v55_v35 = vor.u32 1.1754944e-38, %v54_v28  ;;  %vm53_vm7 = vcmp.eq.f32.partialorder %v52_v27, 8.507059e+37  ;;  %143 = vrcp.f32 %v42_v13 }
  0x1a   :  { %vm63_vm8 = vweird.f32 %v42_v13  ;;  %v67_v51 = vand.u32 2147483647, %v42_v13  ;;  %v70_v52 = vor.u32 1.1754944e-38, %v69_v49 }
  0x1c   :  { %v138_v20 = vpop.eup %137  ;;  %vm68_vm11 = vcmp.eq.f32.partialorder %v67_v51, 8.507059e+37 }
  0x1d   :  { %v140_v21 = vpop.eup %139  ;;  %v75_v22 = vmul.f32 0.6931472, %v138_v20 }
  0x1e   :  { %v44_v23 = vmul.f32 %v140_v21, %v41_v10  ;;  %v142_v25 = vpop.eup %141  ;;  %vm49_vm4 = vweird.f32 %v140_v21 }
  0x1f   :  { %v81_v26 = vsel %vm80_vm1, %v78_v18, %v75_v22  ;;  %v84_v31 = vmul.f32 0.6931472, %v142_v25  ;;  %vm50_vm6 = vmor %vm48_vm2, %vm49_vm4  ;;  %v144_v45 = vpop.eup %143 }
  0x20   :  { %v91_v29 = vmul.f32 2.0, %v81_v26  ;;  %v45_v30 = vsub.f32 1.0, %v44_v23  ;;  %v59_v46 = vmul.f32 %v144_v45, %v42_v13  ;;  %vm64_vm9 = vweird.f32 %v144_v45 }
  0x21   :  { %v90_v34 = vsel %vm89_vm3, %v87_v24, %v84_v31  ;;  %vm65_vm10 = vmor %vm63_vm8, %vm64_vm9 }
  0x22   :  { %v93_v32 = vadd.f32 %v91_v29, %v29_v2  ;;  %v46_v33 = vmul.f32 %v140_v21, %v45_v30  ;;  %v92_v36 = vmul.f32 2.0, %v90_v34  ;;  %v60_v47 = vsub.f32 1.0, %v59_v46 }
  0x24   :  { %v95_v37 = vsub.f32 0.0, %v93_v32  ;;  %v47_v38 = vadd.f32 %v140_v21, %v46_v33  ;;  %v94_v41 = vadd.f32 %v92_v36, %v30_v3  ;;  %v61_v48 = vmul.f32 %v144_v45, %v60_v47 }
  0x26   :  { %99 = vadd.xlane.f32.xlu0 %v95_v37  ;;  %v51_v40 = vsel %vm50_vm6, %v140_v21, %v47_v38  ;;  %v96_v44 = vsub.f32 0.0, %v94_v41  ;;  %v62_v50 = vadd.f32 %v144_v45, %v61_v48 }
  0x27   :  { %v56_v42 = vsel %vm53_vm7, %v55_v35, %v51_v40 }
  0x28   :  { %v57_v43 = vmul.f32 %v56_v42, %v39_v39  ;;  %v66_v53 = vsel %vm65_vm10, %v144_v45, %v62_v50 }
  0x29   :  { %v71_v54 = vsel %vm68_vm11, %v70_v52, %v66_v53 }
  0x2a   :  { %97 = vst [vmem:[#allocation5] sm:$0xff] %v57_v43  ;;  %v72_v55 = vmul.f32 %v71_v54, %v222_v12 }
  0x2c   :  { %98 = vst [vmem:[#allocation5 + $0x8] sm:$0xff] %v72_v55 }
  0x2d   :  { %118 = dma.vmem_to_hbm [thread:$0]  %s111_s16, 256, %s113_s19, [#allocation4], %s198_s14, %s198_s14, %s199_s15  }
  0x2e   :  { %101 = vadd.xlane.f32.xlu0 %v96_v44 }
  0x99   :  { %v100_v56 = vpop.xlane.xlu0 %99 }
  0x9a   :  { %104 = vst.msk [vmem:[%s240_s2] sm:$0xff] %vm103_vm12, %v100_v56 }
  0xa1   :  { %v102_v57 = vpop.xlane.xlu0 %101 }
  0xa2   :  { %105 = vst.msk [vmem:[%s240_s2 + $0x8] sm:$0xff] %vm103_vm12, %v102_v57 }
  0xa3   :  { %195 = dma.done.wait [#allocation4], 256  }
  0xa4   :  { %196 = vsyncadd [#allocation4], 4294967040 }
  0xa5   :  { %127 = vsyncpa [#allocation3], 1 }
  0xa6   :  { %128 = vsyncpa [#allocation4], 1 }

</bundles_post_ra>
